<compile_context>
chip_gen: v5e
topology: v5e:2x2
jax: 0.10.0
libtpu: 0.0.40
codegen_flags: <defaults>
</compile_context>

<pallas_src>
import functools

import jax
import jax.numpy as jnp
from jax.experimental import pallas as pl
from jax.experimental.pallas import tpu as pltpu


def logic_net_kernel(x_ref, w_ref, b_ref, o_ref, acc_ref):
    # Grid: (M//tm, N//tn, K//tk); K (reduction) is the last, "arbitrary" axis.
    k = pl.program_id(2)

    @pl.when(k == 0)
    def _():
        acc_ref[...] = jnp.zeros_like(acc_ref)

    # MXU matmul: x tile [tm, tk] @ w tile [tk, tn] -> f32 accumulator.
    acc_ref[...] += jnp.dot(
        x_ref[...], w_ref[...], preferred_element_type=jnp.float32
    )

    @pl.when(k == pl.num_programs(2) - 1)
    def _():
        z = acc_ref[...] + b_ref[...]          # bias broadcast [1, tn] -> [tm, tn]
        o_ref[...] = jax.nn.sigmoid(z).astype(o_ref.dtype)   # exp/recip on EUP


def _round_up(v, m):
    return ((v + m - 1) // m) * m


@functools.partial(jax.jit, static_argnames=("tm", "tn", "tk"))
def logic_net_forward(x, weight, bias, *, tm=128, tn=128, tk=128):
    """x: [B, in_f]; weight: [out_f, in_f] (PyTorch layout); bias: [out_f]."""
    B, in_f = x.shape
    out_f, in_f2 = weight.shape
    assert in_f == in_f2 and bias.shape == (out_f,)

    # Pre-transpose in the wrapper (free layout plumbing): W^T is [in_f, out_f].
    w_t = weight.T

    # Tile sizes clamped to the (aligned) problem size, then pad to tile multiples.
    tm = min(tm, _round_up(B, 8))
    tn = min(tn, _round_up(out_f, 128))
    tk = min(tk, _round_up(in_f, 128))
    M = _round_up(B, tm)
    K = _round_up(in_f, tk)
    N = _round_up(out_f, tn)

    # Zero-pad: padded K contributes 0 to the dot; padded M/N rows/cols are
    # sliced off below, so semantics match the unpadded linear exactly.
    x_p = jnp.pad(x, ((0, M - B), (0, K - in_f)))
    w_p = jnp.pad(w_t, ((0, K - in_f), (0, N - out_f)))
    b_p = jnp.pad(bias, (0, N - out_f)).reshape(1, N)

    out_padded = pl.pallas_call(
        logic_net_kernel,
        out_shape=jax.ShapeDtypeStruct((M, N), jnp.float32),
        grid_spec=pltpu.PrefetchScalarGridSpec(
            num_scalar_prefetch=0,
            grid=(M // tm, N // tn, K // tk),
            in_specs=[
                pl.BlockSpec((tm, tk), lambda i, j, k: (i, k)),   # x tile
                pl.BlockSpec((tk, tn), lambda i, j, k: (k, j)),   # W^T tile
                pl.BlockSpec((1, tn), lambda i, j, k: (0, j)),    # bias tile
            ],
            out_specs=pl.BlockSpec((tm, tn), lambda i, j, k: (i, j)),
            scratch_shapes=[pltpu.VMEM((tm, tn), jnp.float32)],
        ),
        compiler_params=pltpu.CompilerParams(
            dimension_semantics=("parallel", "parallel", "arbitrary"),
            vmem_limit_bytes=64 * 1024 * 1024,
        ),
    )(x_p, w_p, b_p)

    return out_padded[:B, :out_f]


if __name__ == "__main__":
    # Small shapes consistent with the module: Linear(input_neurons, output_neurons)
    batch = 8
    input_neurons = 32
    hidden = 16           # unused by forward (matches the PyTorch module)
    output_neurons = 8

    key = jax.random.PRNGKey(0)
    kx, kw, kb = jax.random.split(key, 3)

    # Deterministic synthetic params, matching nn.init.uniform_(-1, 1) distribution.
    x = jax.random.normal(kx, (batch, input_neurons), dtype=jnp.float32)
    weight = jax.random.uniform(kw, (output_neurons, input_neurons),
                                dtype=jnp.float32, minval=-1.0, maxval=1.0)
    bias = jax.random.uniform(kb, (output_neurons,),
                              dtype=jnp.float32, minval=-1.0, maxval=1.0)

    out = logic_net_forward(x, weight, bias)
    out = jax.block_until_ready(out)

    # Reference check in plain JAX.
    ref = jax.nn.sigmoid(x @ weight.T + bias)
    assert out.shape == (batch, output_neurons)
    assert jnp.allclose(out, ref, atol=1e-5, rtol=1e-5), "mismatch vs reference"

    print("KERNEL_OK")
</pallas_src>

<mosaic_0001>
module attributes {stable_mosaic.version = 11 : i64} {
  func.func @logic_net_kernel(%arg0: i32, %arg1: i32, %arg2: i32, %arg3: memref<8x128xf32, #tpu.memory_space<vmem>>, %arg4: memref<128x128xf32, #tpu.memory_space<vmem>>, %arg5: memref<1x128xf32, #tpu.memory_space<vmem>>, %arg6: memref<8x128xf32, #tpu.memory_space<vmem>>, %arg7: memref<8x128xf32, #tpu.memory_space<vmem>>) attributes {dimension_semantics = [#tpu.dimension_semantics<parallel>, #tpu.dimension_semantics<parallel>, #tpu.dimension_semantics<arbitrary>], iteration_bounds = array<i64: 1, 1, 1>, scalar_prefetch = 0 : i64, scratch_operands = 1 : i64, tpu.core_type = #tpu.core_type<tc>, window_params = [{transform_indices = @transform_0, window_bounds = array<i64: 8, 128>}, {transform_indices = @transform_1, window_bounds = array<i64: 128, 128>}, {transform_indices = @transform_2, window_bounds = array<i64: 1, 128>}, {transform_indices = @transform_3, window_bounds = array<i64: 8, 128>}]} {
    %c0_i32 = arith.constant 0 : i32
    %0 = arith.cmpi eq, %arg2, %c0_i32 : i32
    %1 = arith.extui %0 : i1 to i32
    %c0_i32_0 = arith.constant 0 : i32
    %2 = arith.cmpi ne, %1, %c0_i32_0 : i32
    scf.if %2 {
      %cst_10 = arith.constant 0.000000e+00 : f32
      %12 = vector.broadcast %cst_10 : f32 to vector<8x128xf32>
      %c0_11 = arith.constant 0 : index
      %c0_12 = arith.constant 0 : index
      %13 = vector.load %arg7[%c0_11, %c0_12] : memref<8x128xf32, #tpu.memory_space<vmem>>, vector<8x128xf32>
      tpu.vector_store %arg7[%c0_11, %c0_12], %12 {strides = array<i32>} : memref<8x128xf32, #tpu.memory_space<vmem>>, vector<8x128xf32>,
    } else {
    }
    %c0 = arith.constant 0 : index
    %c0_1 = arith.constant 0 : index
    %3 = vector.load %arg7[%c0, %c0_1] : memref<8x128xf32, #tpu.memory_space<vmem>>, vector<8x128xf32>
    %c0_2 = arith.constant 0 : index
    %c0_3 = arith.constant 0 : index
    %4 = vector.load %arg3[%c0_2, %c0_3] : memref<8x128xf32, #tpu.memory_space<vmem>>, vector<8x128xf32>
    %c0_4 = arith.constant 0 : index
    %c0_5 = arith.constant 0 : index
    %5 = vector.load %arg4[%c0_4, %c0_5] : memref<128x128xf32, #tpu.memory_space<vmem>>, vector<128x128xf32>
    %cst = arith.constant dense<0.000000e+00> : vector<8x128xf32>
    %6 = tpu.matmul %4, %5, %cst {dimension_numbers = #tpu.dot_dimension_numbers<[1], [0], [0], [1], [0, 0, 1, 1], [], []>} : vector<8x128xf32>, vector<128x128xf32>, vector<8x128xf32> -> vector<8x128xf32>
    %7 = arith.addf %3, %6 : vector<8x128xf32>
    %c0_6 = arith.constant 0 : index
    %c0_7 = arith.constant 0 : index
    %8 = vector.load %arg7[%c0_6, %c0_7] : memref<8x128xf32, #tpu.memory_space<vmem>>, vector<8x128xf32>
    tpu.vector_store %arg7[%c0_6, %c0_7], %7 {strides = array<i32>} : memref<8x128xf32, #tpu.memory_space<vmem>>, vector<8x128xf32>,
    %c0_i32_8 = arith.constant 0 : i32
    %9 = arith.cmpi eq, %arg2, %c0_i32_8 : i32
    %10 = arith.extui %9 : i1 to i32
    %c0_i32_9 = arith.constant 0 : i32
    %11 = arith.cmpi ne, %10, %c0_i32_9 : i32
    scf.if %11 {
      %c0_10 = arith.constant 0 : index
      %c0_11 = arith.constant 0 : index
      %12 = vector.load %arg7[%c0_10, %c0_11] : memref<8x128xf32, #tpu.memory_space<vmem>>, vector<8x128xf32>
      %c0_12 = arith.constant 0 : index
      %c0_13 = arith.constant 0 : index
      %13 = vector.load %arg5[%c0_12, %c0_13] : memref<1x128xf32, #tpu.memory_space<vmem>>, vector<1x128xf32>
      %14 = vector.broadcast %13 : vector<1x128xf32> to vector<8x128xf32>
      %15 = arith.addf %12, %14 : vector<8x128xf32>
      %16 = arith.negf %15 : vector<8x128xf32>
      %17 = math.exp %16 : vector<8x128xf32>
      %cst_14 = arith.constant 1.000000e+00 : f32
      %18 = vector.broadcast %cst_14 : f32 to vector<8x128xf32>
      %19 = arith.addf %18, %17 : vector<8x128xf32>
      %20 = arith.divf %18, %19 : vector<8x128xf32>
      %c0_15 = arith.constant 0 : index
      %c0_16 = arith.constant 0 : index
      %21 = vector.load %arg6[%c0_15, %c0_16] : memref<8x128xf32, #tpu.memory_space<vmem>>, vector<8x128xf32>
      tpu.vector_store %arg6[%c0_15, %c0_16], %20 {strides = array<i32>} : memref<8x128xf32, #tpu.memory_space<vmem>>, vector<8x128xf32>,
    } else {
    }
    return
  }
  func.func @transform_0(%arg0: i32, %arg1: i32, %arg2: i32) -> (i32, i32) {
    %c0_i32 = arith.constant 0 : i32
    return %arg0, %arg2 : i32, i32
  }
  func.func @transform_1(%arg0: i32, %arg1: i32, %arg2: i32) -> (i32, i32) {
    %c0_i32 = arith.constant 0 : i32
    return %arg2, %arg1 : i32, i32
  }
  func.func @transform_2(%arg0: i32, %arg1: i32, %arg2: i32) -> (i32, i32) {
    %c0_i32 = arith.constant 0 : i32
    %c0_i32_0 = arith.constant 0 : i32
    return %c0_i32, %arg1 : i32, i32
  }
  func.func @transform_3(%arg0: i32, %arg1: i32, %arg2: i32) -> (i32, i32) {
    %c0_i32 = arith.constant 0 : i32
    return %arg0, %arg1 : i32, i32
  }
}

</mosaic_0001>

<bundles_post_ra>
// kernel: logic_net_forward.1
= control target key start
LH: loop header
LB: loop body
LE: loop exit
PB: predicated region body
PF: predicated region fallthrough
CT: control target
= control target key end

     0   :  { %s216_s0 = inlined_call_operand.vmem [shape: f32[8,128], index: 0, kind: input, shape index: {}]   ;;  %s217_s1 = inlined_call_operand.vmem [shape: f32[128,128], index: 1, kind: input, shape index: {}]   ;;  %s218_s2 = inlined_call_operand.vmem [shape: f32[1,128], index: 2, kind: input, shape index: {}]   ;;  %s219_s3 = inlined_call_operand.hbm [shape: f32[8,128], index: 3, kind: output, shape index: {}]  }
   0x1   :  { %v37_v0 = vld [vmem:[%s217_s1 + $0x78] sm:$0xff]  ;;  %v36_v1 = vld [vmem:[%s217_s1 + $0x70] sm:$0xff]  ;;  %v35_v2 = vld [vmem:[%s217_s1 + $0x68] sm:$0xff] }
   0x2   :  { %38 = vmatpush.msra.mxu0 %v37_v0  ;;  %v34_v3 = vld [vmem:[%s217_s1 + $0x60] sm:$0xff]  ;;  %v33_v4 = vld [vmem:[%s217_s1 + $0x58] sm:$0xff] }
   0x4   :  { %39 = vmatpush.msra.mxu0 %v36_v1 }
   0x6   :  { %40 = vmatpush.msra.mxu0 %v35_v2 }
   0x7   :  { %8 = vsyncpa [#allocation4], 0  ;;  %v32_v5 = vld [vmem:[%s217_s1 + $0x50] sm:$0xff]  ;;  %v31_v6 = vld [vmem:[%s217_s1 + $0x48] sm:$0xff] }
   0x8   :  { %41 = vmatpush.msra.mxu0 %v34_v3  ;;  %v30_v7 = vld [vmem:[%s217_s1 + $0x40] sm:$0xff]  ;;  %v29_v8 = vld [vmem:[%s217_s1 + $0x38] sm:$0xff]  ;;  %v28_v9 = vld [vmem:[%s217_s1 + $0x30] sm:$0xff] }
   0x9   :  { %v27_v10 = vld [vmem:[%s217_s1 + $0x28] sm:$0xff]  ;;  %v26_v11 = vld [vmem:[%s217_s1 + $0x20] sm:$0xff]  ;;  %v25_v12 = vld [vmem:[%s217_s1 + $0x18] sm:$0xff] }
   0xa   :  { %42 = vmatpush.msra.mxu0 %v33_v4  ;;  %v24_v13 = vld [vmem:[%s217_s1 + $0x10] sm:$0xff]  ;;  %v23_v14 = vld [vmem:[%s217_s1 + $0x8] sm:$0xff]  ;;  %v22_v15 = vld [vmem:[%s217_s1] sm:$0xff] }
   0xb   :  { %v21_v16 = vld [vmem:[%s216_s0] sm:$0xff]  ;;  %s138_s0 = smov [#allocation3]  }
   0xc   :  { %43 = vmatpush.msra.mxu0 %v32_v5  ;;  %v107_v17 = vld [vmem:[%s218_s2] ss:$0 sm:$0xff]  ;;  %s94_s1 = sshll.u32 %s138_s0, 4  ;;  %s96_s2 = sshll.u32 %s219_s3, 4  ;;  %s95_s1 = int_to_ptr.vmem [resolvable:$true] %s94_s1  ;;  %s97_s2 = int_to_ptr.hbm [resolvable:$true] %s96_s2 }
   0xe   :  { %44 = vmatpush.msra.mxu0 %v31_v6 }
  0x10   :  { %45 = vmatpush.msra.mxu0 %v30_v7 }
  0x12   :  { %46 = vmatpush.msra.mxu0 %v29_v8 }
  0x14   :  { %47 = vmatpush.msra.mxu0 %v28_v9 }
  0x16   :  { %48 = vmatpush.msra.mxu0 %v27_v10 }
  0x18   :  { %49 = vmatpush.msra.mxu0 %v26_v11 }
  0x1a   :  { %50 = vmatpush.msra.mxu0 %v25_v12 }
  0x1c   :  { %51 = vmatpush.msra.mxu0 %v24_v13 }
  0x1e   :  { %52 = vmatpush.msra.mxu0 %v23_v14 }
  0x20   :  { %53 = vmatpush.msra.mxu0 %v22_v15 }
  0x21   :  { %54 = vmatmul.f32.vlgmr.msra.gmra.mxu0 %v21_v16 }
  0x9e   :  { %v55_v18 = vpop.f32.mrf.mxu0 }
  0x9f   :  { %v68_v19 = vadd.f32 %v107_v17, %v55_v18 }
  0xa1   :  { %v105_v20 = vmul.f32 -1.442695, %v68_v19 }
  0xa3   :  { %108 = vpow2.f32 %v105_v20 }
  0xa9   :  { %v109_v21 = vpop.eup %108 }
  0xaa   :  { %v72_v22 = vadd.f32 1.0, %v109_v21 }
  0xac   :  { %110 = vrcp.f32 %v72_v22  ;;  %v84_v26 = vand.u32 2147483648, %v72_v22  ;;  %v82_v28 = vand.u32 2147483647, %v72_v22  ;;  %vm78_vm1 = vweird.f32 %v72_v22 }
  0xae   :  { %v85_v30 = vor.u32 1.1754944e-38, %v84_v26  ;;  %vm83_vm3 = vcmp.eq.f32.partialorder %v82_v28, 8.507059e+37 }
  0xb2   :  { %v111_v23 = vpop.eup %110 }
  0xb3   :  { %v74_v24 = vmul.f32 %v111_v23, %v72_v22  ;;  %vm79_vm0 = vweird.f32 %v111_v23 }
  0xb4   :  { %vm80_vm2 = vmor %vm78_vm1, %vm79_vm0 }
  0xb5   :  { %v75_v25 = vsub.f32 1.0, %v74_v24 }
  0xb7   :  { %v76_v27 = vmul.f32 %v111_v23, %v75_v25 }
  0xb9   :  { %v77_v29 = vadd.f32 %v111_v23, %v76_v27 }
  0xbb   :  { %v81_v31 = vsel %vm80_vm2, %v111_v23, %v77_v29 }
  0xbc   :  { %v86_v32 = vsel %vm83_vm3, %v85_v30, %v81_v31 }
  0xbd   :  { %88 = vst [vmem:[#allocation3] sm:$0xff] %v86_v32 }
  0xbe   :  { %99 = dma.vmem_to_hbm [thread:$0]  %s95_s1, 128, %s97_s2, [#allocation4]  }
  0xbf   :  { %136 = dma.done.wait [#allocation4], 128  }
  0xc0   :  { %137 = vsyncadd [#allocation4], 4294967168 }
  0xc1   :  { %104 = vsyncpa [#allocation4], 1 }

</bundles_post_ra>
